<compile_context>
chip_gen: v5e
topology: v5e:2x2
jax: 0.10.0
libtpu: 0.0.40
codegen_flags: <defaults>
</compile_context>

<pallas_src>
import math

import jax
import jax.numpy as jnp
from jax.experimental import pallas as pl
from jax.experimental.pallas import tpu as pltpu


def _round_up(x, m):
    return (x + m - 1) // m * m


def _mlp_kernel(x_ref, w1_ref, b1_ref, w2_ref, b2_ref, o_ref):
    # x_ref:  (tm, K) activation dtype   w1_ref: (K, H) bf16   b1_ref: (1, H) f32
    # w2_ref: (H, N) bf16                b2_ref: (1, N) f32    o_ref:  (tm, N) activation dtype
    # Cast the activations to the MXU dtype on the fly (VPU slot, hidden under MXU).
    x = x_ref[...].astype(w1_ref.dtype)

    # linear_1 (bf16 inputs, f32 accumulation)
    h = jnp.dot(x, w1_ref[...], preferred_element_type=jnp.float32) + b1_ref[...]

    # GELU with tanh approximation (matches nn.GELU(approximate='tanh')), f32 math.
    c = jnp.float32(math.sqrt(2.0 / math.pi))
    g = 0.5 * h * (1.0 + jnp.tanh(c * (h + jnp.float32(0.044715) * (h * h * h))))

    # linear_2 (bf16 inputs, f32 accumulation)
    out = jnp.dot(g.astype(w2_ref.dtype), w2_ref[...],
                  preferred_element_type=jnp.float32) + b2_ref[...]

    o_ref[...] = out.astype(o_ref.dtype)


def prepare_pixart_text_projection_params(w1, b1, w2, b2, compute_dtype=jnp.bfloat16):
    """One-time weight preparation (call at model init, NOT per forward).

    w1: (in_features, hidden), w2: (hidden, out_features)  -- transposed vs. PyTorch.
    Weights -> bf16 (MXU dtype); biases -> (1, dim) f32 rows."""
    return (jnp.asarray(w1, compute_dtype),
            jnp.asarray(b1, jnp.float32).reshape(1, -1),
            jnp.asarray(w2, compute_dtype),
            jnp.asarray(b2, jnp.float32).reshape(1, -1))


def pixart_alpha_text_projection(caption, params, *, tm=None):
    """caption: (B, S, in_features); params from prepare_pixart_text_projection_params.
    Returns (B, S, out_features) in caption.dtype."""
    w1, b1, w2, b2 = params
    B, S, K = caption.shape
    Kw, H = w1.shape
    Hw, N = w2.shape
    assert K == Kw and H == Hw, "weight shapes inconsistent with caption"

    M = B * S
    x2d = caption.reshape(M, K)                       # view, no copy
    act_itemsize = jnp.dtype(caption.dtype).itemsize

    # ---- Hardware-aware tiling / VMEM budget --------------------------------
    try:
        vmem_cap = pltpu.get_tpu_info().vmem_capacity_bytes
    except Exception:
        vmem_cap = 64 * 1024 * 1024                   # assume the smaller v7x VMEM
    vmem_ceiling = (vmem_cap * 3) // 4                # headroom for Mosaic scratch

    weight_bytes = (w1.size * w1.dtype.itemsize + w2.size * w2.dtype.itemsize
                    + (b1.size + b2.size) * 4)

    def _vmem_needed(rows):
        return (weight_bytes                                   # resident, single-buffered
                + 2 * rows * K * act_itemsize                  # x tile, double-buffered
                + 2 * rows * N * act_itemsize                  # out tile, double-buffered
                + rows * H * 6 + rows * N * 4)                 # f32 h + bf16 g + f32 out

    if tm is None:
        # Bigger row tiles on 128-MiB-VMEM parts (v5e/v6e), 256 on v7x (64 MiB).
        tm_cap = 512 if vmem_cap >= (100 << 20) else 256
        if M >= 2 * tm_cap:
            tm = tm_cap
        elif M >= 32:
            # Guarantee >= 2 grid steps so both v7x TensorCores get work.
            tm = min(tm_cap, _round_up(pl.cdiv(M, 2), 16))
        else:
            tm = M                                    # tiny launch: weight-fetch bound anyway
    tm = min(tm, M)
    # Shrink the row tile if the footprint would not fit this generation's VMEM.
    while _vmem_needed(tm) > vmem_ceiling and tm > 64:
        tm = max(64, tm // 2)
    # TODO(synk): tile the hidden dim (grid axis over H + f32 accumulator with
    # pl.when init) if the resident weights alone ever exceed the VMEM ceiling.

    # Ragged last tile is fine: garbage rows are row-local through both matmuls
    # and are never written back to HBM.
    grid = (pl.cdiv(M, tm),)

    cost = pl.CostEstimate(
        flops=2 * M * (K * H + H * N),
        transcendentals=M * H,                        # tanh in the GELU
        bytes_accessed=(M * K * act_itemsize + weight_bytes + M * N * act_itemsize),
    )

    vmem_limit = int(min(max(_vmem_needed(tm) * 3 // 2, 8 * 1024 * 1024),
                         vmem_ceiling))

    out2d = pl.pallas_call(
        _mlp_kernel,
        out_shape=jax.ShapeDtypeStruct((M, N), caption.dtype),
        grid_spec=pltpu.PrefetchScalarGridSpec(
            num_scalar_prefetch=0,
            grid=grid,
            in_specs=[
                pl.BlockSpec((tm, K), lambda i: (i, 0)),             # activations (streamed)
                # Grid-invariant operands: whole-array resident in VMEM,
                # no per-step double-buffering.
                pl.BlockSpec(memory_space=pltpu.MemorySpace.VMEM),   # w1
                pl.BlockSpec(memory_space=pltpu.MemorySpace.VMEM),   # b1
                pl.BlockSpec(memory_space=pltpu.MemorySpace.VMEM),   # w2
                pl.BlockSpec(memory_space=pltpu.MemorySpace.VMEM),   # b2
            ],
            out_specs=pl.BlockSpec((tm, N), lambda i: (i, 0)),
        ),
        compiler_params=pltpu.CompilerParams(
            dimension_semantics=("parallel",),
            vmem_limit_bytes=vmem_limit),
        cost_estimate=cost,
    )(x2d, w1, b1, w2, b2)

    return out2d.reshape(B, S, N)


def _reference(caption, w1, b1, w2, b2):
    h = jnp.einsum("bsi,ih->bsh", caption, w1) + b1
    c = math.sqrt(2.0 / math.pi)
    g = 0.5 * h * (1.0 + jnp.tanh(c * (h + 0.044715 * h**3)))
    return jnp.einsum("bsh,ho->bso", g, w2) + b2


if __name__ == "__main__":
    # Small, forward-consistent shapes.
    B, S = 2, 8
    in_features, hidden_size, out_features = 32, 64, 32

    key = jax.random.PRNGKey(0)
    k_x, k_w1, k_b1, k_w2, k_b2 = jax.random.split(key, 5)

    caption = jax.random.normal(k_x, (B, S, in_features), dtype=jnp.float32)

    # Deterministic init mimicking nn.Linear's uniform(-1/sqrt(fan_in), 1/sqrt(fan_in)).
    lim1 = 1.0 / math.sqrt(in_features)
    lim2 = 1.0 / math.sqrt(hidden_size)
    w1 = jax.random.uniform(k_w1, (in_features, hidden_size), jnp.float32, -lim1, lim1)
    b1 = jax.random.uniform(k_b1, (hidden_size,), jnp.float32, -lim1, lim1)
    w2 = jax.random.uniform(k_w2, (hidden_size, out_features), jnp.float32, -lim2, lim2)
    b2 = jax.random.uniform(k_b2, (out_features,), jnp.float32, -lim2, lim2)

    # One-time weight preparation, hoisted out of the per-call path.
    params = prepare_pixart_text_projection_params(w1, b1, w2, b2)

    out = pixart_alpha_text_projection(caption, params)
    out = jax.block_until_ready(out)

    ref = _reference(caption, w1, b1, w2, b2)
    assert out.shape == (B, S, out_features)
    # bf16 matmul inputs with f32 accumulation -> slightly looser tolerance.
    assert jnp.allclose(out, ref, atol=3e-2, rtol=3e-2)

    print("KERNEL_OK")
</pallas_src>

<mosaic_0001>
module attributes {stable_mosaic.version = 11 : i64} {
  func.func @_mlp_kernel(%arg0: i32, %arg1: memref<16x32xf32, #tpu.memory_space<vmem>>, %arg2: memref<32x64xbf16, #tpu.memory_space<vmem>>, %arg3: memref<1x64xf32, #tpu.memory_space<vmem>>, %arg4: memref<64x32xbf16, #tpu.memory_space<vmem>>, %arg5: memref<1x32xf32, #tpu.memory_space<vmem>>, %arg6: memref<16x32xf32, #tpu.memory_space<vmem>>) attributes {dimension_semantics = [#tpu.dimension_semantics<parallel>], iteration_bounds = array<i64: 1>, scalar_prefetch = 0 : i64, scratch_operands = 0 : i64, tpu.core_type = #tpu.core_type<tc>, window_params = [{transform_indices = @transform_0, window_bounds = array<i64: 16, 32>}, {pipeline_mode = #tpu.pipeline_mode<synchronous>, transform_indices = @transform_1, window_bounds = array<i64: 32, 64>}, {pipeline_mode = #tpu.pipeline_mode<synchronous>, transform_indices = @transform_2, window_bounds = array<i64: 1, 64>}, {pipeline_mode = #tpu.pipeline_mode<synchronous>, transform_indices = @transform_3, window_bounds = array<i64: 64, 32>}, {pipeline_mode = #tpu.pipeline_mode<synchronous>, transform_indices = @transform_4, window_bounds = array<i64: 1, 32>}, {transform_indices = @transform_5, window_bounds = array<i64: 16, 32>}]} {
    %c0 = arith.constant 0 : index
    %c0_0 = arith.constant 0 : index
    %0 = vector.load %arg1[%c0, %c0_0] : memref<16x32xf32, #tpu.memory_space<vmem>>, vector<16x32xf32>
    %1 = arith.truncf %0 : vector<16x32xf32> to vector<16x32xbf16>
    %c0_1 = arith.constant 0 : index
    %c0_2 = arith.constant 0 : index
    %2 = vector.load %arg2[%c0_1, %c0_2] : memref<32x64xbf16, #tpu.memory_space<vmem>>, vector<32x64xbf16>
    %cst = arith.constant dense<0.000000e+00> : vector<16x64xf32>
    %3 = tpu.matmul %1, %2, %cst {dimension_numbers = #tpu.dot_dimension_numbers<[1], [0], [0], [1], [0, 0, 1, 1], [], []>} : vector<16x32xbf16>, vector<32x64xbf16>, vector<16x64xf32> -> vector<16x64xf32>
    %c0_3 = arith.constant 0 : index
    %c0_4 = arith.constant 0 : index
    %4 = vector.load %arg3[%c0_3, %c0_4] : memref<1x64xf32, #tpu.memory_space<vmem>>, vector<1x64xf32>
    %5 = vector.broadcast %4 : vector<1x64xf32> to vector<16x64xf32>
    %6 = arith.addf %3, %5 : vector<16x64xf32>
    %cst_5 = arith.constant 5.000000e-01 : f32
    %7 = vector.broadcast %cst_5 : f32 to vector<16x64xf32>
    %8 = arith.mulf %7, %6 : vector<16x64xf32>
    %9 = arith.mulf %6, %6 : vector<16x64xf32>
    %10 = arith.mulf %9, %6 : vector<16x64xf32>
    %cst_6 = arith.constant 4.471500e-02 : f32
    %11 = vector.broadcast %cst_6 : f32 to vector<16x64xf32>
    %12 = arith.mulf %11, %10 : vector<16x64xf32>
    %13 = arith.addf %6, %12 : vector<16x64xf32>
    %cst_7 = arith.constant 0.797884583 : f32
    %14 = vector.broadcast %cst_7 : f32 to vector<16x64xf32>
    %15 = arith.mulf %14, %13 : vector<16x64xf32>
    %16 = math.tanh %15 : vector<16x64xf32>
    %cst_8 = arith.constant 1.000000e+00 : f32
    %17 = vector.broadcast %cst_8 : f32 to vector<16x64xf32>
    %18 = arith.addf %17, %16 : vector<16x64xf32>
    %19 = arith.mulf %8, %18 : vector<16x64xf32>
    %20 = arith.truncf %19 : vector<16x64xf32> to vector<16x64xbf16>
    %c0_9 = arith.constant 0 : index
    %c0_10 = arith.constant 0 : index
    %21 = vector.load %arg4[%c0_9, %c0_10] : memref<64x32xbf16, #tpu.memory_space<vmem>>, vector<64x32xbf16>
    %cst_11 = arith.constant dense<0.000000e+00> : vector<16x32xf32>
    %22 = tpu.matmul %20, %21, %cst_11 {dimension_numbers = #tpu.dot_dimension_numbers<[1], [0], [0], [1], [0, 0, 1, 1], [], []>} : vector<16x64xbf16>, vector<64x32xbf16>, vector<16x32xf32> -> vector<16x32xf32>
    %c0_12 = arith.constant 0 : index
    %c0_13 = arith.constant 0 : index
    %23 = vector.load %arg5[%c0_12, %c0_13] : memref<1x32xf32, #tpu.memory_space<vmem>>, vector<1x32xf32>
    %24 = vector.broadcast %23 : vector<1x32xf32> to vector<16x32xf32>
    %25 = arith.addf %22, %24 : vector<16x32xf32>
    %c0_14 = arith.constant 0 : index
    %c0_15 = arith.constant 0 : index
    %26 = vector.load %arg6[%c0_14, %c0_15] : memref<16x32xf32, #tpu.memory_space<vmem>>, vector<16x32xf32>
    tpu.vector_store %arg6[%c0_14, %c0_15], %25 {strides = array<i32>} : memref<16x32xf32, #tpu.memory_space<vmem>>, vector<16x32xf32>,
    return
  }
  func.func @transform_0(%arg0: i32) -> (i32, i32) {
    %c0_i32 = arith.constant 0 : i32
    %c0_i32_0 = arith.constant 0 : i32
    return %arg0, %c0_i32 : i32, i32
  }
  func.func @transform_1(%arg0: i32) -> (i32, i32) {
    %c0_i32 = arith.constant 0 : i32
    %c0_i32_0 = arith.constant 0 : i32
    %c0_i32_1 = arith.constant 0 : i32
    return %c0_i32, %c0_i32_0 : i32, i32
  }
  func.func @transform_2(%arg0: i32) -> (i32, i32) {
    %c0_i32 = arith.constant 0 : i32
    %c0_i32_0 = arith.constant 0 : i32
    %c0_i32_1 = arith.constant 0 : i32
    return %c0_i32, %c0_i32_0 : i32, i32
  }
  func.func @transform_3(%arg0: i32) -> (i32, i32) {
    %c0_i32 = arith.constant 0 : i32
    %c0_i32_0 = arith.constant 0 : i32
    %c0_i32_1 = arith.constant 0 : i32
    return %c0_i32, %c0_i32_0 : i32, i32
  }
  func.func @transform_4(%arg0: i32) -> (i32, i32) {
    %c0_i32 = arith.constant 0 : i32
    %c0_i32_0 = arith.constant 0 : i32
    %c0_i32_1 = arith.constant 0 : i32
    return %c0_i32, %c0_i32_0 : i32, i32
  }
  func.func @transform_5(%arg0: i32) -> (i32, i32) {
    %c0_i32 = arith.constant 0 : i32
    %c0_i32_0 = arith.constant 0 : i32
    return %arg0, %c0_i32 : i32, i32
  }
}

</mosaic_0001>

<bundles_post_ra>
// kernel: tpu_custom_call.1
= control target key start
LH: loop header
LB: loop body
LE: loop exit
PB: predicated region body
PF: predicated region fallthrough
CT: control target
= control target key end

     0   :  { %s292_s0 = inlined_call_operand.vmem [shape: f32[16,32], index: 0, kind: input, shape index: {}]   ;;  %s293_s1 = inlined_call_operand.vmem [shape: bf16[32,64], index: 1, kind: input, shape index: {}]   ;;  %s294_s2 = inlined_call_operand.vmem [shape: f32[1,64], index: 2, kind: input, shape index: {}]   ;;  %s295_s3 = inlined_call_operand.vmem [shape: bf16[64,32], index: 3, kind: input, shape index: {}]   ;;  %s296_s4 = inlined_call_operand.vmem [shape: f32[1,32], index: 4, kind: input, shape index: {}]   ;;  %s297_s5 = inlined_call_operand.hbm [shape: f32[16,32], index: 5, kind: output, shape index: {}]  }
   0x1   :  { %v183_v0 = vld [vmem:[%s293_s1 + $0x8] sm:$0xff]  ;;  %v182_v1 = vld [vmem:[%s293_s1] sm:$0xff] }
   0x2   :  { %v22_v2 = vld [vmem:[%s292_s0] sm:$0xff]  ;;  %55 = vmatpush.bf16.msra.mxu0 %v183_v0  ;;  %v23_v3 = vld [vmem:[%s292_s0 + $0x8] sm:$0xff] }
   0x3   :  { %10 = vsyncpa [#allocation3], 0  ;;  %v24_v4 = vpack.c.bf16 %v23_v3, %v22_v2  ;;  %vm45_vm0 = vcmask 261120   ;;  %v187_v5 = vld [vmem:[%s295_s3 + $0x18] sm:$0xff]  ;;  %v186_v6 = vld [vmem:[%s295_s3 + $0x10] sm:$0xff]  ;;  %vm118_vm1 = vcmask 523264  }
   0x4   :  { %126 = vmatpush.bf16.msra.mxu1 %v187_v5  ;;  %v185_v7 = vld [vmem:[%s295_s3 + $0x8] sm:$0xff]  ;;  %v184_v8 = vld [vmem:[%s295_s3] sm:$0xff]  ;;  %s223_s9 = smov [#allocation2]   ;;  %s144_s13 = sshll.u32 %s297_s5, 4  ;;  %s145_s13 = int_to_ptr.hbm [resolvable:$true] %s144_s13 }
   0x5   :  { %v191_v9 = vld [vmem:[%s294_s2] ss:$0 sm:$0xff]  ;;  %s142_s10 = sshll.u32 %s223_s9, 4  ;;  %s224_s14 = smov 128   ;;  %s143_s10 = int_to_ptr.vmem [resolvable:$true] %s142_s10 }
   0x6   :  { %56 = vmatpush.bf16.msra.mxu0 %v182_v1  ;;  %v192_v33 = vld [vmem:[%s296_s4] ss:$0 sm:$0xff]  ;;  %s225_s15 = smov 8  }
   0x8   :  { %127 = vmatpush.bf16.msra.mxu1 %v186_v6 }
   0x9   :  { %164 = vmatmul.msk.bf16.vlgmr.msra.gmra.mxu0 %vm45_vm0, %v24_v4 }
   0xc   :  { %128 = vmatpush.bf16.msra.mxu1 %v185_v7 }
  0x10   :  { %129 = vmatpush.bf16.msra.mxu1 %v184_v8 }
  0x86   :  { %v58_v10 = vpop.f32.mrf.mxu0 }
  0x87   :  { %v59_v11 = vadd.f32 %v191_v9, %v58_v10 }
  0x89   :  { %v65_v12 = vmul.f32 %v59_v11, %v59_v11  ;;  %v63_v27 = vmul.f32 0.5, %v59_v11 }
  0x8b   :  { %v67_v13 = vmul.f32 %v65_v12, %v59_v11 }
  0x8d   :  { %v69_v14 = vmul.f32 0.044715, %v67_v13 }
  0x8e   :  { %v60_v15 = vpop.f32.mrf.mxu0 }
  0x8f   :  { %v71_v16 = vadd.f32 %v69_v14, %v59_v11  ;;  %v61_v17 = vadd.f32 %v191_v9, %v60_v15 }
  0x91   :  { %v66_v18 = vmul.f32 %v61_v17, %v61_v17  ;;  %v73_v19 = vmul.f32 0.7978846, %v71_v16  ;;  %v64_v28 = vmul.f32 0.5, %v61_v17 }
  0x93   :  { %v68_v20 = vmul.f32 %v66_v18, %v61_v17  ;;  %193 = vtanh.f32 %v73_v19 }
  0x95   :  { %v70_v21 = vmul.f32 0.044715, %v68_v20 }
  0x97   :  { %v72_v22 = vadd.f32 %v70_v21, %v61_v17 }
  0x99   :  { %v74_v23 = vmul.f32 0.7978846, %v72_v22  ;;  %v194_v24 = vpop.eup %193 }
  0x9a   :  { %v77_v25 = vadd.f32 1.0, %v194_v24 }
  0x9b   :  { %195 = vtanh.f32 %v74_v23 }
  0x9c   :  { %v79_v30 = vmul.f32 %v77_v25, %v63_v27 }
  0xa1   :  { %v196_v26 = vpop.eup %195 }
  0xa2   :  { %v78_v29 = vadd.f32 1.0, %v196_v26 }
  0xa4   :  { %v80_v31 = vmul.f32 %v78_v29, %v64_v28 }
  0xa6   :  { %v81_v32 = vpack.c.bf16 %v80_v31, %v79_v30 }
  0xa8   :  { %181 = vmatmul.msk.bf16.vlgmr.msra.gmra.mxu1 %vm118_vm1, %v81_v32 }
 0x125   :  { %v131_v34 = vpop.f32.mrf.mxu1 }
 0x126   :  { %v132_v35 = vadd.f32 %v192_v33, %v131_v34 }
 0x128   :  { %136 = vst.msk [vmem:[#allocation2] sm:$0xff] %vm45_vm0, %v132_v35 }
 0x12d   :  { %v133_v36 = vpop.f32.mrf.mxu1 }
 0x12e   :  { %v134_v37 = vadd.f32 %v192_v33, %v133_v36 }
 0x130   :  { %137 = vst.msk [vmem:[#allocation2 + $0x8] sm:$0xff] %vm45_vm0, %v134_v37 }
 0x131   :  { %150 = dma.vmem_to_hbm [thread:$0]  %s143_s10, 256, %s145_s13, [#allocation3], %s224_s14, %s224_s14, %s225_s15  }
 0x132   :  { %221 = dma.done.wait [#allocation3], 256  }
 0x133   :  { %222 = vsyncadd [#allocation3], 4294967040 }
 0x134   :  { %155 = vsyncpa [#allocation3], 1 }

</bundles_post_ra>
